<compile_context>
chip_gen: v7x
topology: tpu7x:2x2x1
jax: 0.10.0
libtpu: 0.0.40
codegen_flags: <defaults>
</compile_context>

<pallas_src>
import functools

import jax
import jax.numpy as jnp
from jax import lax
from jax.experimental import pallas as pl
from jax.experimental.pallas import tpu as pltpu

_MIB = 1024 * 1024
_FAST_PATH_BUDGET = 36 * _MIB   # footprint below which weights stay VMEM-resident
_VMEM_CAP = 48 * _MIB           # hard cap for vmem_limit_bytes (v7x-safe)
_INV_SQRT2 = 0.7071067811865476


def _round_up(x, m):
    return (x + m - 1) // m * m


def _default_row_tile():
    """Per-generation row-tile preference (used by the weight-streaming path)."""
    try:
        kind = jax.devices()[0].device_kind.lower()
    except Exception:
        return 512
    if "v5" in kind:
        return 256       # v5e crossover ~240 flop/byte
    if "v6" in kind:
        return 768       # v6e needs ~650 flop/byte to leave the BW roofline
    return 512           # v7x and newer (~310 flop/byte crossover)


def _choose_row_tiling(n_rows, preferred):
    """Pick (tm, rows_padded) minimising zero-row padding; split rows into >=2
    tiles when large enough (lets the 'parallel' axis shard across v7x's 2 TCs)."""
    rows8 = _round_up(n_rows, 8)
    if rows8 <= preferred:
        if rows8 >= 256:                       # worth 2 tiles (megacore)
            tm = _round_up((rows8 + 1) // 2, 8)
            return tm, 2 * tm
        return rows8, rows8                    # one small tile, minimal pad
    preferred = max(preferred, 128)
    best_tm, best_pad = None, None
    for cand in range(128, preferred + 1, 128):
        pad = _round_up(n_rows, cand) - n_rows
        if best_pad is None or pad < best_pad or (pad == best_pad and cand > best_tm):
            best_tm, best_pad = cand, pad
    return best_tm, _round_up(n_rows, best_tm)


def _stream_need(tm_c, th_c, dim_p, x_isz, w_isz):
    """Approximate VMEM footprint (bytes) of the streaming path at (tm_c, th_c)."""
    return (2 * tm_c * dim_p * x_isz          # x tiles (double-buffered)
            + 2 * dim_p * th_c * w_isz        # W1 hidden slab
            + 2 * th_c * dim_p * w_isz        # W2 hidden slab
            + 2 * (th_c + dim_p) * w_isz      # biases
            + 2 * tm_c * dim_p * x_isz        # out tiles
            + tm_c * dim_p * 4                # f32 accumulator scratch
            + tm_c * th_c * 4)                # f32 hidden intermediate


def _gelu_exact(h):
    # Exact (erf-based) GELU — matches torch.nn.GELU() default.
    return 0.5 * h * (1.0 + lax.erf(h * jnp.float32(_INV_SQRT2)))


# ----------------------------------------------------------------------------
# Kernels
# ----------------------------------------------------------------------------
def _ffn_fused_kernel(x_ref, w1_ref, b1_ref, w2_ref, b2_ref, o_ref):
    """Weights-resident fast path: full fc1 -> GELU -> fc2 on one row tile."""
    h = jnp.dot(x_ref[...], w1_ref[...], preferred_element_type=jnp.float32)
    h = h + b1_ref[...].astype(jnp.float32)
    h = _gelu_exact(h)
    # Dropout -> identity at inference.
    y = jnp.dot(h.astype(w2_ref.dtype), w2_ref[...],
                preferred_element_type=jnp.float32)
    y = y + b2_ref[...].astype(jnp.float32)
    o_ref[...] = y.astype(o_ref.dtype)


def _ffn_stream_kernel(x_ref, w1_ref, b1_ref, w2_ref, b2_ref, o_ref, acc_ref):
    """Streaming fallback: hidden axis tiled, fc2 partials accumulated in f32."""
    h_idx = pl.program_id(1)

    @pl.when(h_idx == 0)
    def _():
        acc_ref[...] = jnp.zeros_like(acc_ref)

    h = jnp.dot(x_ref[...], w1_ref[...], preferred_element_type=jnp.float32)
    h = h + b1_ref[...].astype(jnp.float32)
    h = _gelu_exact(h)
    # Dropout -> identity at inference.
    acc_ref[...] += jnp.dot(h.astype(w2_ref.dtype), w2_ref[...],
                            preferred_element_type=jnp.float32)

    @pl.when(h_idx == pl.num_programs(1) - 1)
    def _():
        y = acc_ref[...] + b2_ref[...].astype(jnp.float32)
        o_ref[...] = y.astype(o_ref.dtype)


# ----------------------------------------------------------------------------
# Wrapper
# ----------------------------------------------------------------------------
def prepare_params(w1, b1, w2, b2):
    """Pad Linear params to lane-dense (128-multiple) shapes ONCE, at init.
    Padding never runs in the per-call forward; no-op if already aligned."""
    dim, mlp_dim = w1.shape
    b1 = b1.reshape(1, mlp_dim)
    b2 = b2.reshape(1, dim)
    dim_p = _round_up(dim, 128)
    mlp_p = _round_up(mlp_dim, 128)
    if (dim_p, mlp_p) == (dim, mlp_dim):
        return w1, b1, w2, b2
    w1_p = jnp.pad(w1, ((0, dim_p - dim), (0, mlp_p - mlp_dim)))
    b1_p = jnp.pad(b1, ((0, 0), (0, mlp_p - mlp_dim)))
    w2_p = jnp.pad(w2, ((0, mlp_p - mlp_dim), (0, dim_p - dim)))
    b2_p = jnp.pad(b2, ((0, 0), (0, dim_p - dim)))
    return w1_p, b1_p, w2_p, b2_p


@functools.partial(jax.jit, static_argnames=("tm", "th"))
def _feed_forward_impl(z, w1_p, b1_p, w2_p, b2_p, *, tm, th):
    B, M, dim = z.shape
    dim_p, mlp_p = w1_p.shape
    assert dim_p % 128 == 0 and mlp_p % 128 == 0 and dim_p >= dim, \
        "weights must be pre-padded with prepare_params()"
    n_rows = B * M
    x_isz = jnp.dtype(z.dtype).itemsize
    w_isz = jnp.dtype(w1_p.dtype).itemsize

    # ---- path selection (static / trace-time) -------------------------------
    rows8 = _round_up(n_rows, 8)
    tm_dec = min(tm, rows8)
    weight_bytes = (2 * dim_p * mlp_p + mlp_p + dim_p) * w_isz
    fast_need = (2 * weight_bytes                 # weights (double-buffered)
                 + 4 * tm_dec * dim_p * x_isz     # x + out tiles
                 + tm_dec * mlp_p * 4)            # f32 hidden intermediate
    use_fast = fast_need <= _FAST_PATH_BUDGET

    if use_fast:
        # -------- weights-resident fast path ---------------------------------
        tm_eff, rows_p = _choose_row_tiling(n_rows, tm)
        x = z.reshape(n_rows, dim)
        if rows_p != n_rows or dim_p != dim:
            x = jnp.pad(x, ((0, rows_p - n_rows), (0, dim_p - dim)))
        n_row_tiles = rows_p // tm_eff

        cost = pl.CostEstimate(
            flops=4 * rows_p * dim_p * mlp_p,
            transcendentals=rows_p * mlp_p,
            bytes_accessed=2 * rows_p * dim_p * x_isz + weight_bytes)
        vmem_limit = int(min(_VMEM_CAP, max(32 * _MIB, 2 * fast_need)))

        out = pl.pallas_call(
            _ffn_fused_kernel,
            out_shape=jax.ShapeDtypeStruct((rows_p, dim_p), z.dtype),
            grid_spec=pltpu.PrefetchScalarGridSpec(
                num_scalar_prefetch=0,
                grid=(n_row_tiles,),
                in_specs=[
                    pl.BlockSpec((tm_eff, dim_p), lambda i: (i, 0)),  # x row tile
                    pl.BlockSpec((dim_p, mlp_p), lambda i: (0, 0)),   # W1 (resident)
                    pl.BlockSpec((1, mlp_p), lambda i: (0, 0)),       # b1 (resident)
                    pl.BlockSpec((mlp_p, dim_p), lambda i: (0, 0)),   # W2 (resident)
                    pl.BlockSpec((1, dim_p), lambda i: (0, 0)),       # b2 (resident)
                ],
                out_specs=pl.BlockSpec((tm_eff, dim_p), lambda i: (i, 0)),
            ),
            compiler_params=pltpu.CompilerParams(
                dimension_semantics=("parallel",),
                vmem_limit_bytes=vmem_limit),
            cost_estimate=cost,
        )(x, w1_p, b1_p, w2_p, b2_p)
    else:
        # -------- streaming fallback (very large mlp_dim) ---------------------
        th_eff = max(256, (th // 256) * 256)   # multiple of 256 for the MXU
        tm_pref = max(128, tm)
        while (_stream_need(tm_pref, th_eff, dim_p, x_isz, w_isz)
               > _FAST_PATH_BUDGET and tm_pref > 128):
            tm_pref = max(128, tm_pref // 2)
        while (_stream_need(tm_pref, th_eff, dim_p, x_isz, w_isz)
               > _FAST_PATH_BUDGET and th_eff > 256):
            th_eff = max(256, th_eff // 2)

        # Pad hidden dim UP to a multiple of th_eff (rare, one-off per call for
        # unusual mlp_dim) instead of collapsing th_eff to a small divisor.
        mlp_pp = _round_up(mlp_p, th_eff)
        if mlp_pp != mlp_p:
            w1_p = jnp.pad(w1_p, ((0, 0), (0, mlp_pp - mlp_p)))
            b1_p = jnp.pad(b1_p, ((0, 0), (0, mlp_pp - mlp_p)))
            w2_p = jnp.pad(w2_p, ((0, mlp_pp - mlp_p), (0, 0)))

        tm_eff, rows_p = _choose_row_tiling(n_rows, tm_pref)
        x = z.reshape(n_rows, dim)
        if rows_p != n_rows or dim_p != dim:
            x = jnp.pad(x, ((0, rows_p - n_rows), (0, dim_p - dim)))
        n_row_tiles = rows_p // tm_eff

        cost = pl.CostEstimate(
            flops=4 * rows_p * dim_p * mlp_pp,
            transcendentals=rows_p * mlp_pp,
            bytes_accessed=(2 * rows_p * dim_p * x_isz
                            + n_row_tiles * (2 * dim_p * mlp_pp + mlp_pp + dim_p) * w_isz))
        need = _stream_need(tm_eff, th_eff, dim_p, x_isz, w_isz)
        vmem_limit = int(min(_VMEM_CAP, max(32 * _MIB, 2 * need)))

        out = pl.pallas_call(
            _ffn_stream_kernel,
            out_shape=jax.ShapeDtypeStruct((rows_p, dim_p), z.dtype),
            grid_spec=pltpu.PrefetchScalarGridSpec(
                num_scalar_prefetch=0,
                grid=(n_row_tiles, mlp_pp // th_eff),
                in_specs=[
                    pl.BlockSpec((tm_eff, dim_p), lambda i, h: (i, 0)),   # x row tile
                    pl.BlockSpec((dim_p, th_eff), lambda i, h: (0, h)),   # W1 hidden tile
                    pl.BlockSpec((1, th_eff), lambda i, h: (0, h)),       # b1 hidden tile
                    pl.BlockSpec((th_eff, dim_p), lambda i, h: (h, 0)),   # W2 hidden tile
                    pl.BlockSpec((1, dim_p), lambda i, h: (0, 0)),        # b2
                ],
                out_specs=pl.BlockSpec((tm_eff, dim_p), lambda i, h: (i, 0)),
                scratch_shapes=[pltpu.VMEM((tm_eff, dim_p), jnp.float32)],
            ),
            compiler_params=pltpu.CompilerParams(
                dimension_semantics=("parallel", "arbitrary"),
                vmem_limit_bytes=vmem_limit),
            cost_estimate=cost,
        )(x, w1_p, b1_p, w2_p, b2_p)

    if out.shape != (n_rows, dim):
        out = out[:n_rows, :dim]
    return out.reshape(B, M, dim)


def feed_forward(z, w1_p, b1_p, w2_p, b2_p, *, tm=None, th=512):
    """z: (B, M, dim); weights pre-padded via prepare_params(). Returns (B, M, dim)."""
    if tm is None:
        tm = _default_row_tile()
    return _feed_forward_impl(z, w1_p, b1_p, w2_p, b2_p, tm=tm, th=th)


def init_params(key, dim, mlp_dim, dtype=jnp.float32):
    """Deterministic init mimicking nn.Linear (uniform in +-1/sqrt(fan_in))."""
    k1, k2, k3, k4 = jax.random.split(key, 4)
    lim1 = 1.0 / jnp.sqrt(dim)
    lim2 = 1.0 / jnp.sqrt(mlp_dim)
    w1 = jax.random.uniform(k1, (dim, mlp_dim), dtype, -lim1, lim1)
    b1 = jax.random.uniform(k2, (1, mlp_dim), dtype, -lim1, lim1)
    w2 = jax.random.uniform(k3, (mlp_dim, dim), dtype, -lim2, lim2)
    b2 = jax.random.uniform(k4, (1, dim), dtype, -lim2, lim2)
    return w1, b1, w2, b2


if __name__ == "__main__":
    B, M, dim, mlp_dim = 2, 8, 32, 64  # batch=2, tokens=8, dim=32, hidden=64
    key = jax.random.PRNGKey(0)
    kz, kp = jax.random.split(key)
    z = jax.random.normal(kz, (B, M, dim), jnp.float32)
    w1, b1, w2, b2 = init_params(kp, dim, mlp_dim)

    # One-time padding at init (kept out of the per-call forward path).
    w1_p, b1_p, w2_p, b2_p = prepare_params(w1, b1, w2, b2)

    out = feed_forward(z, w1_p, b1_p, w2_p, b2_p)
    jax.block_until_ready(out)

    # Reference check in plain JAX (exact GELU, dropout=identity).
    h = z.reshape(B * M, dim) @ w1 + b1
    h = 0.5 * h * (1.0 + lax.erf(h / jnp.sqrt(2.0)))
    ref = (h @ w2 + b2).reshape(B, M, dim)
    assert jnp.allclose(out, ref, atol=1e-5, rtol=1e-5), \
        float(jnp.max(jnp.abs(out - ref)))

    print("KERNEL_OK")
</pallas_src>

<mosaic_0001>
module attributes {stable_mosaic.version = 11 : i64} {
  func.func @_ffn_fused_kernel(%arg0: i32, %arg1: memref<16x128xf32, #tpu.memory_space<vmem>>, %arg2: memref<128x128xf32, #tpu.memory_space<vmem>>, %arg3: memref<1x128xf32, #tpu.memory_space<vmem>>, %arg4: memref<128x128xf32, #tpu.memory_space<vmem>>, %arg5: memref<1x128xf32, #tpu.memory_space<vmem>>, %arg6: memref<16x128xf32, #tpu.memory_space<vmem>>) attributes {dimension_semantics = [#tpu.dimension_semantics<parallel>], iteration_bounds = array<i64: 1>, scalar_prefetch = 0 : i64, scratch_operands = 0 : i64, tpu.core_type = #tpu.core_type<tc>, window_params = [{transform_indices = @transform_0, window_bounds = array<i64: 16, 128>}, {pipeline_mode = #tpu.pipeline_mode<synchronous>, transform_indices = @transform_1, window_bounds = array<i64: 128, 128>}, {pipeline_mode = #tpu.pipeline_mode<synchronous>, transform_indices = @transform_2, window_bounds = array<i64: 1, 128>}, {pipeline_mode = #tpu.pipeline_mode<synchronous>, transform_indices = @transform_3, window_bounds = array<i64: 128, 128>}, {pipeline_mode = #tpu.pipeline_mode<synchronous>, transform_indices = @transform_4, window_bounds = array<i64: 1, 128>}, {transform_indices = @transform_5, window_bounds = array<i64: 16, 128>}]} {
    %c0 = arith.constant 0 : index
    %c0_0 = arith.constant 0 : index
    %0 = vector.load %arg1[%c0, %c0_0] : memref<16x128xf32, #tpu.memory_space<vmem>>, vector<16x128xf32>
    %c0_1 = arith.constant 0 : index
    %c0_2 = arith.constant 0 : index
    %1 = vector.load %arg2[%c0_1, %c0_2] : memref<128x128xf32, #tpu.memory_space<vmem>>, vector<128x128xf32>
    %cst = arith.constant dense<0.000000e+00> : vector<16x128xf32>
    %2 = tpu.matmul %0, %1, %cst {dimension_numbers = #tpu.dot_dimension_numbers<[1], [0], [0], [1], [0, 0, 1, 1], [], []>} : vector<16x128xf32>, vector<128x128xf32>, vector<16x128xf32> -> vector<16x128xf32>
    %c0_3 = arith.constant 0 : index
    %c0_4 = arith.constant 0 : index
    %3 = vector.load %arg3[%c0_3, %c0_4] : memref<1x128xf32, #tpu.memory_space<vmem>>, vector<1x128xf32>
    %4 = vector.broadcast %3 : vector<1x128xf32> to vector<16x128xf32>
    %5 = arith.addf %2, %4 : vector<16x128xf32>
    %cst_5 = arith.constant 5.000000e-01 : f32
    %6 = vector.broadcast %cst_5 : f32 to vector<16x128xf32>
    %7 = arith.mulf %6, %5 : vector<16x128xf32>
    %cst_6 = arith.constant 0.707106769 : f32
    %8 = vector.broadcast %cst_6 : f32 to vector<16x128xf32>
    %9 = arith.mulf %5, %8 : vector<16x128xf32>
    %10 = math.erf %9 : vector<16x128xf32>
    %cst_7 = arith.constant 1.000000e+00 : f32
    %11 = vector.broadcast %cst_7 : f32 to vector<16x128xf32>
    %12 = arith.addf %11, %10 : vector<16x128xf32>
    %13 = arith.mulf %7, %12 : vector<16x128xf32>
    %c0_8 = arith.constant 0 : index
    %c0_9 = arith.constant 0 : index
    %14 = vector.load %arg4[%c0_8, %c0_9] : memref<128x128xf32, #tpu.memory_space<vmem>>, vector<128x128xf32>
    %cst_10 = arith.constant dense<0.000000e+00> : vector<16x128xf32>
    %15 = tpu.matmul %13, %14, %cst_10 {dimension_numbers = #tpu.dot_dimension_numbers<[1], [0], [0], [1], [0, 0, 1, 1], [], []>} : vector<16x128xf32>, vector<128x128xf32>, vector<16x128xf32> -> vector<16x128xf32>
    %c0_11 = arith.constant 0 : index
    %c0_12 = arith.constant 0 : index
    %16 = vector.load %arg5[%c0_11, %c0_12] : memref<1x128xf32, #tpu.memory_space<vmem>>, vector<1x128xf32>
    %17 = vector.broadcast %16 : vector<1x128xf32> to vector<16x128xf32>
    %18 = arith.addf %15, %17 : vector<16x128xf32>
    %c0_13 = arith.constant 0 : index
    %c0_14 = arith.constant 0 : index
    %19 = vector.load %arg6[%c0_13, %c0_14] : memref<16x128xf32, #tpu.memory_space<vmem>>, vector<16x128xf32>
    tpu.vector_store %arg6[%c0_13, %c0_14], %18 {strides = array<i32>} : memref<16x128xf32, #tpu.memory_space<vmem>>, vector<16x128xf32>,
    return
  }
  func.func @transform_0(%arg0: i32) -> (i32, i32) {
    %c0_i32 = arith.constant 0 : i32
    %c0_i32_0 = arith.constant 0 : i32
    return %arg0, %c0_i32 : i32, i32
  }
  func.func @transform_1(%arg0: i32) -> (i32, i32) {
    %c0_i32 = arith.constant 0 : i32
    %c0_i32_0 = arith.constant 0 : i32
    %c0_i32_1 = arith.constant 0 : i32
    return %c0_i32, %c0_i32_0 : i32, i32
  }
  func.func @transform_2(%arg0: i32) -> (i32, i32) {
    %c0_i32 = arith.constant 0 : i32
    %c0_i32_0 = arith.constant 0 : i32
    %c0_i32_1 = arith.constant 0 : i32
    return %c0_i32, %c0_i32_0 : i32, i32
  }
  func.func @transform_3(%arg0: i32) -> (i32, i32) {
    %c0_i32 = arith.constant 0 : i32
    %c0_i32_0 = arith.constant 0 : i32
    %c0_i32_1 = arith.constant 0 : i32
    return %c0_i32, %c0_i32_0 : i32, i32
  }
  func.func @transform_4(%arg0: i32) -> (i32, i32) {
    %c0_i32 = arith.constant 0 : i32
    %c0_i32_0 = arith.constant 0 : i32
    %c0_i32_1 = arith.constant 0 : i32
    return %c0_i32, %c0_i32_0 : i32, i32
  }
  func.func @transform_5(%arg0: i32) -> (i32, i32) {
    %c0_i32 = arith.constant 0 : i32
    %c0_i32_0 = arith.constant 0 : i32
    return %arg0, %c0_i32 : i32, i32
  }
}

</mosaic_0001>

<bundles_post_ra>
// kernel: _feed_forward_impl.1
= control target key start
LH: loop header
LB: loop body
LE: loop exit
PB: predicated region body
PF: predicated region fallthrough
CT: control target
= control target key end

     0   :  { %10 = vsyncpa [#allocation3], 0  ;;  %s568_s0 = inlined_call_operand.vmem [shape: f32[16,128], index: 0, kind: input, shape index: {}]   ;;  %s569_s1 = inlined_call_operand.hbm [shape: f32[128,128], index: 1, kind: input, shape index: {}]   ;;  %s570_s2 = inlined_call_operand.vmem [shape: f32[1,128], index: 2, kind: input, shape index: {}]   ;;  %s571_s3 = inlined_call_operand.hbm [shape: f32[128,128], index: 3, kind: input, shape index: {}]   ;;  %s572_s4 = inlined_call_operand.vmem [shape: f32[1,128], index: 4, kind: input, shape index: {}]   ;;  %s573_s5 = inlined_call_operand.vmem [shape: f32[16,128], index: 5, kind: output, shape index: {}]  }
   0x1   :  { %11 = vsyncpa [#allocation5], 0  ;;  %s492_s18 = smov [#allocation2]   ;;  %s444_s22 = scalar_lea.hbm %s569_s1, 2048 }
   0x2   :  { %s19_s19 = sshll.u32 %s492_s18, 4  ;;  %p445_p0 = scmp.ne.s32.totalorder %s569_s1, %s444_s22  ;;  %s20_s19 = int_to_ptr.vmem [resolvable:$true] %s19_s19 }
   0x3   :  { %p448_p1 = scmp.lt.u32.totalorder %s444_s22, %s569_s1 }
   0x5   :  { %p450_p2 = pnand %p448_p1, %p445_p0 }
   0x7   :  { %453 = shalt.err (!%p450_p2)
}
   0x8   :  { %s454_s27 = scalar_lea.vmem %s20_s19, 2048  ;;  %p459_p4 = scmp.lt.s32.totalorder %s20_s19, %s20_s19 }
   0x9   :  { %p455_p3 = scmp.ne.s32.totalorder %s20_s19, %s454_s27  ;;  %p460_p5 = scmp.lt.s32.totalorder %s454_s27, %s454_s27 }
   0xb   :  { %p461_p6 = por %p460_p5, %p459_p4 }
   0xd   :  { %p462_p7 = pnand %p461_p6, %p455_p3 }
   0xf   :  { %465 = shalt.err (!%p462_p7)
}
  0x10   :  { %s493_s28 = smov 128   ;;  %s494_s29 = smov 8  }
  0x11   :  { %25 = dma.hbm_to_vmem [thread:$0]  %s569_s1, 2048, %s20_s19, [#allocation3], %s493_s28, %s493_s28, %s494_s29  }
  0x12   :  { %s495_s7 = smov [#allocation4]   ;;  %s466_s11 = scalar_lea.hbm %s571_s3, 2048 }
  0x13   :  { %s33_s8 = sshll.u32 %s495_s7, 4  ;;  %p467_p8 = scmp.ne.s32.totalorder %s571_s3, %s466_s11  ;;  %s34_s8 = int_to_ptr.vmem [resolvable:$true] %s33_s8 }
  0x14   :  { %p470_p9 = scmp.lt.u32.totalorder %s466_s11, %s571_s3 }
  0x16   :  { %p472_p10 = pnand %p470_p9, %p467_p8 }
  0x18   :  { %475 = shalt.err (!%p472_p10)
}
  0x19   :  { %s476_s16 = scalar_lea.vmem %s34_s8, 2048  ;;  %p481_p12 = scmp.lt.s32.totalorder %s34_s8, %s34_s8 }
  0x1a   :  { %p477_p11 = scmp.ne.s32.totalorder %s34_s8, %s476_s16  ;;  %p482_p13 = scmp.lt.s32.totalorder %s476_s16, %s476_s16 }
  0x1c   :  { %p483_p0 = por %p482_p13, %p481_p12 }
  0x1e   :  { %p484_p1 = pnand %p483_p0, %p477_p11 }
  0x20   :  { %487 = shalt.err (!%p484_p1)
}
  0x21   :  { %39 = dma.hbm_to_vmem [thread:$0]  %s571_s3, 2048, %s34_s8, [#allocation5], %s493_s28, %s493_s28, %s494_s29  }
  0x22   :  { %488 = dma.done.wait [#allocation3], 2048  }
  0x23   :  { %489 = vsyncadd [#allocation3], 4294965248 }
  0x24   :  { %490 = dma.done.wait [#allocation5], 2048  }
  0x25   :  { %491 = vsyncadd [#allocation5], 4294965248  ;;  %v50_v0 = vld [vmem:[#allocation2] sm:$0xff]  ;;  %v51_v1 = vld [vmem:[#allocation2 + $0x8] sm:$0xff] }
  0x26   :  { %v52_v2 = vld [vmem:[#allocation2 + $0x10] sm:$0xff]  ;;  %v372_v3 = vpack.c.bf16 %v51_v1, %v50_v0  ;;  %v53_v4 = vld [vmem:[#allocation2 + $0x18] sm:$0xff]  ;;  %v54_v6 = vld [vmem:[#allocation2 + $0x20] sm:$0xff] }
  0x27   :  { %v376_v5 = vpack.c.bf16 %v53_v4, %v52_v2  ;;  %v55_v7 = vld [vmem:[#allocation2 + $0x28] sm:$0xff]  ;;  %v56_v9 = vld [vmem:[#allocation2 + $0x30] sm:$0xff]  ;;  %v57_v10 = vld [vmem:[#allocation2 + $0x38] sm:$0xff] }
  0x28   :  { %373 = vmatprep.subr.bf16.mxu0 %v372_v3  ;;  %v380_v8 = vpack.c.bf16 %v55_v7, %v54_v6  ;;  %v48_v11 = vld [vmem:[%s568_s0] sm:$0xff]  ;;  %v159_v13 = vld [vmem:[#allocation4 + $0x8] sm:$0xff]  ;;  %v160_v14 = vld [vmem:[#allocation4 + $0x10] sm:$0xff]  ;;  %v384_v20 = vpack.c.bf16 %v57_v10, %v56_v9 }
  0x29   :  { %375 = vmatpush3.bf16.msra.mxu0 %v372_v3  ;;  %334 = vmatprep.mubr.f32.mxu0 %v48_v11  ;;  %v158_v12 = vld [vmem:[#allocation4] sm:$0xff]  ;;  %v161_v16 = vld [vmem:[#allocation4 + $0x18] sm:$0xff]  ;;  %v163_v19 = vld [vmem:[#allocation4 + $0x28] sm:$0xff] }
  0x2a   :  { %377 = vmatprep.subr.bf16.mxu0 %v376_v5  ;;  %v404_v15 = vpack.c.bf16 %v159_v13, %v158_v12  ;;  %v408_v17 = vpack.c.bf16 %v161_v16, %v160_v14  ;;  %v162_v18 = vld [vmem:[#allocation4 + $0x20] sm:$0xff]  ;;  %v59_v22 = vld [vmem:[#allocation2 + $0x48] sm:$0xff]  ;;  %v60_v25 = vld [vmem:[#allocation2 + $0x50] sm:$0xff] }
  0x2b   :  { %v58_v21 = vld [vmem:[#allocation2 + $0x40] sm:$0xff]  ;;  %v412_v23 = vpack.c.bf16 %v163_v19, %v162_v18  ;;  %v61_v26 = vld [vmem:[#allocation2 + $0x58] sm:$0xff]  ;;  %v63_v29 = vld [vmem:[#allocation2 + $0x68] sm:$0xff] }
  0x2c   :  { %405 = vmatprep.subr.bf16.mxu1 %v404_v15  ;;  %v388_v24 = vpack.c.bf16 %v59_v22, %v58_v21  ;;  %v392_v27 = vpack.c.bf16 %v61_v26, %v60_v25  ;;  %v62_v28 = vld [vmem:[#allocation2 + $0x60] sm:$0xff]  ;;  %v64_v31 = vld [vmem:[#allocation2 + $0x70] sm:$0xff]  ;;  %v65_v32 = vld [vmem:[#allocation2 + $0x78] sm:$0xff] }
  0x2d   :  { %379 = vmatpush3.bf16.msra.mxu0 %v376_v5  ;;  %407 = vmatpush3.bf16.msra.mxu1 %v404_v15  ;;  %v396_v30 = vpack.c.bf16 %v63_v29, %v62_v28  ;;  %v400_v33 = vpack.c.bf16 %v65_v32, %v64_v31  ;;  %v49_v34 = vld [vmem:[%s568_s0 + $0x8] sm:$0xff]  ;;  %v164_v35 = vld [vmem:[#allocation4 + $0x30] sm:$0xff]  ;;  %v165_v36 = vld [vmem:[#allocation4 + $0x38] sm:$0xff] }
  0x2e   :  { %381 = vmatprep.subr.bf16.mxu0 %v380_v8  ;;  %409 = vmatprep.subr.bf16.mxu1 %v408_v17  ;;  %v416_v37 = vpack.c.bf16 %v165_v36, %v164_v35  ;;  %v166_v38 = vld [vmem:[#allocation4 + $0x40] sm:$0xff]  ;;  %v167_v39 = vld [vmem:[#allocation4 + $0x48] sm:$0xff]  ;;  %v168_v41 = vld [vmem:[#allocation4 + $0x50] sm:$0xff] }
  0x2f   :  { %v420_v40 = vpack.c.bf16 %v167_v39, %v166_v38  ;;  %v169_v42 = vld [vmem:[#allocation4 + $0x58] sm:$0xff]  ;;  %v170_v44 = vld [vmem:[#allocation4 + $0x60] sm:$0xff]  ;;  %v171_v45 = vld [vmem:[#allocation4 + $0x68] sm:$0xff] }
  0x30   :  { %v424_v43 = vpack.c.bf16 %v169_v42, %v168_v41  ;;  %v428_v46 = vpack.c.bf16 %v171_v45, %v170_v44  ;;  %v172_v47 = vld [vmem:[#allocation4 + $0x70] sm:$0xff]  ;;  %v173_v48 = vld [vmem:[#allocation4 + $0x78] sm:$0xff]  ;;  %v264_v50 = vld [vmem:[%s570_s2] ss:$0 sm:$0xff] }
  0x31   :  { %383 = vmatpush3.bf16.msra.mxu0 %v380_v8  ;;  %411 = vmatpush3.bf16.msra.mxu1 %v408_v17  ;;  %v432_v49 = vpack.c.bf16 %v173_v48, %v172_v47  ;;  %v265_v1 = vld [vmem:[%s572_s4] ss:$0 sm:$0xff] }
  0x32   :  { %385 = vmatprep.subr.bf16.mxu0 %v384_v20  ;;  %413 = vmatprep.subr.bf16.mxu1 %v412_v23 }
  0x35   :  { %387 = vmatpush3.bf16.msra.mxu0 %v384_v20  ;;  %415 = vmatpush3.bf16.msra.mxu1 %v412_v23 }
  0x36   :  { %389 = vmatprep.subr.bf16.mxu0 %v388_v24  ;;  %417 = vmatprep.subr.bf16.mxu1 %v416_v37 }
  0x39   :  { %391 = vmatpush3.bf16.msra.mxu0 %v388_v24  ;;  %419 = vmatpush3.bf16.msra.mxu1 %v416_v37 }
  0x3a   :  { %393 = vmatprep.subr.bf16.mxu0 %v392_v27  ;;  %421 = vmatprep.subr.bf16.mxu1 %v420_v40 }
  0x3d   :  { %395 = vmatpush3.bf16.msra.mxu0 %v392_v27  ;;  %423 = vmatpush3.bf16.msra.mxu1 %v420_v40 }
  0x3e   :  { %397 = vmatprep.subr.bf16.mxu0 %v396_v30  ;;  %425 = vmatprep.subr.bf16.mxu1 %v424_v43 }
  0x41   :  { %399 = vmatpush3.bf16.msra.mxu0 %v396_v30  ;;  %427 = vmatpush3.bf16.msra.mxu1 %v424_v43 }
  0x42   :  { %401 = vmatprep.subr.bf16.mxu0 %v400_v33  ;;  %429 = vmatprep.subr.bf16.mxu1 %v428_v46 }
  0x45   :  { %403 = vmatpush3.bf16.msra.mxu0 %v400_v33  ;;  %431 = vmatpush3.bf16.msra.mxu1 %v428_v46 }
  0x46   :  { %433 = vmatprep.subr.bf16.mxu1 %v432_v49 }
  0x48   :  { %335 = vmatmul.mubr.f32.vlgmr.msra.gmra.mrb[0].mxu0 %v49_v34 }
  0x49   :  { %435 = vmatpush3.bf16.msra.mxu1 %v432_v49 }
 0x11b   :  { %v336_v51 = vpop.f32.mrb[0].mxu0 }
 0x11c   :  { %v145_v52 = vadd.f32 %v336_v51, %v264_v50  ;;  %v139_v53 = vpop.f32.mrb[1].mxu0 }
 0x11d   :  { %v140_v54 = vadd.f32 %v264_v50, %v139_v53 }
 0x11e   :  { %v151_v55 = vmul.f32 0.70710677, %v145_v52  ;;  %v149_v62 = vmul.f32 0.5, %v145_v52 }
 0x11f   :  { %v150_v56 = vmul.f32 0.70710677, %v140_v54  ;;  %v148_v60 = vmul.f32 0.5, %v140_v54 }
 0x120   :  { %440 = verf.f32 %v151_v55 }
 0x121   :  { %442 = verf.f32 %v150_v56 }
 0x12a   :  { %v441_v57 = vpop.eup %440 }
 0x12b   :  { %v443_v58 = vpop.eup %442  ;;  %v155_v59 = vadd.f32 1.0, %v441_v57 }
 0x12c   :  { %v154_v61 = vadd.f32 1.0, %v443_v58 }
 0x12d   :  { %v157_v0 = vmul.f32 %v155_v59, %v149_v62 }
 0x12e   :  { %v156_v63 = vmul.f32 %v154_v61, %v148_v60 }
 0x130   :  { %369 = vmatprep.mubr.f32.mxu1 %v156_v63 }
 0x131   :  { %370 = vmatmul.mubr.f32.vlgmr.msra.gmra.mrb[0].mxu1 %v157_v0 }
 0x204   :  { %v371_v2 = vpop.f32.mrb[0].mxu1 }
 0x205   :  { %v253_v3 = vadd.f32 %v371_v2, %v265_v1  ;;  %v247_v4 = vpop.f32.mrb[1].mxu1 }
 0x206   :  { %v248_v5 = vadd.f32 %v265_v1, %v247_v4 }
 0x207   :  { %257 = vst [vmem:[%s573_s5 + $0x8] sm:$0xff] %v253_v3 }
 0x208   :  { %256 = vst [vmem:[%s573_s5] sm:$0xff] %v248_v5 }
 0x209   :  { %262 = vsyncpa [#allocation3], 1 }
 0x20a   :  { %263 = vsyncpa [#allocation5], 1 }

</bundles_post_ra>
